<compile_context>
chip_gen: v5e
topology: v5e:2x2
jax: 0.10.0
libtpu: 0.0.40
codegen_flags: <defaults>
</compile_context>

<pallas_src>
import jax
import jax.numpy as jnp
from jax.experimental import pallas as pl
from jax.experimental.pallas import tpu as pltpu


# ---------------------------------------------------------------------------
# Kernels
# ---------------------------------------------------------------------------

def _rows_kernel(x_ref, g_ref, b_ref, o_ref):
    """LayerNorm over the full row (lane axis).  x_ref block: (tm, F)."""
    x = x_ref[...].astype(jnp.float32)
    n = x.shape[-1]
    mean = jnp.mean(x, axis=-1, keepdims=True)
    diff = x - mean
    # torch .var() default: unbiased (divide by N-1).  n == 1 -> 0/0 = NaN,
    # matching torch.
    var = jnp.sum(diff * diff, axis=-1, keepdims=True) / jnp.float32(n - 1)
    inv = jax.lax.rsqrt(var + 1e-8)
    o_ref[...] = (diff * inv * g_ref[...] + b_ref[...]).astype(o_ref.dtype)


def _make_grouped_kernel(F):
    """LayerNorm over stride-Q groups inside a lane-dense row.

    The block is (tm, L) with L = F * Q laid out exactly as in HBM
    (lane l = f * Q + q); lanes sharing the same q form one normalization
    group.  m_ref is an (L, Q) 0/1 mask with m[l, q] = (l % Q == q) and
    mt_ref = m.T.  Group reductions and the broadcast of the per-group stats
    back to every lane ride the MXU (idle in this memory-bound kernel) at
    HIGHEST precision so f32 numerics match a plain reduction.
    """
    hi = jax.lax.Precision.HIGHEST
    inv_f = 1.0 / F

    def kernel(x_ref, g_ref, b_ref, m_ref, mt_ref, o_ref):
        x = x_ref[...].astype(jnp.float32)
        m = m_ref[...]
        mt = mt_ref[...]
        sums = jnp.dot(x, m, precision=hi,
                       preferred_element_type=jnp.float32)          # (tm, Q)
        mean_q = sums * inv_f
        mean = jnp.dot(mean_q, mt, precision=hi,
                       preferred_element_type=jnp.float32)           # (tm, L)
        diff = x - mean
        ss = jnp.dot(diff * diff, m, precision=hi,
                     preferred_element_type=jnp.float32)             # (tm, Q)
        # torch .var() default: unbiased (divide by N-1); F == 1 -> NaN like torch.
        var_q = ss / jnp.float32(F - 1)
        inv_q = jax.lax.rsqrt(var_q + 1e-8)
        inv = jnp.dot(inv_q, mt, precision=hi,
                      preferred_element_type=jnp.float32)            # (tm, L)
        o_ref[...] = (diff * inv * g_ref[...] + b_ref[...]).astype(o_ref.dtype)

    return kernel


# ---------------------------------------------------------------------------
# Tiling / pallas_call driver
# ---------------------------------------------------------------------------

def _prod(xs):
    p = 1
    for v in xs:
        p *= int(v)
    return p


def _pick_tm(P, L, itemsize, *, block_budget_bytes=8 * 1024 * 1024, tm_max=1024):
    """Pick the row-tile size.

    As large as the VMEM block budget allows (double-buffered in + out blocks),
    capped at tm_max, a multiple of the dtype's sublane tile, and preferring a
    grid of >= 2 steps so v7x can shard rows across its two TensorCores.
    (gamma/beta and the small group masks are negligible and ignored here.)
    """
    sub = max(8, 32 // max(itemsize, 1))        # 8 (f32) / 16 (bf16) / 32 (int8)
    per_row = 4 * itemsize * L                  # 2 x (in + out) double buffers
    tm = min(tm_max, max(sub, block_budget_bytes // max(per_row, 1)))
    tm = max(sub, (int(tm) // sub) * sub)
    while tm > sub and pl.cdiv(P, tm) < 2:
        tm = max(sub, ((tm // 2) // sub) * sub)
    return int(tm)


def _layernorm_flat(x2d, gamma_row, beta_row, *, F, Q):
    """x2d: (P, L) with L = F * Q.  Each (row, q) group of F elements is
    normalized independently (Q == 1 -> plain per-row LayerNorm).
    Returns a (P, L) array in x2d.dtype."""
    P, L = int(x2d.shape[0]), int(x2d.shape[1])
    assert L == F * Q
    itemsize = jnp.dtype(x2d.dtype).itemsize
    tm = _pick_tm(P, L, itemsize)
    grid = (pl.cdiv(P, tm),)

    gamma_row = jnp.asarray(gamma_row, jnp.float32).reshape(1, L)
    beta_row = jnp.asarray(beta_row, jnp.float32).reshape(1, L)

    x_spec = pl.BlockSpec((tm, L), lambda i: (i, 0))
    row_spec = pl.BlockSpec((1, L), lambda i: (0, 0))
    out_spec = pl.BlockSpec((tm, L), lambda i: (i, 0))

    if Q == 1:
        kernel = _rows_kernel
        inputs = (x2d, gamma_row, beta_row)
        in_specs = [x_spec, row_spec, row_spec]
    else:
        lane_mod = jnp.arange(L, dtype=jnp.int32) % Q
        qs = jnp.arange(Q, dtype=jnp.int32)
        m = (lane_mod[:, None] == qs[None, :]).astype(jnp.float32)   # (L, Q)
        mt = (qs[:, None] == lane_mod[None, :]).astype(jnp.float32)  # (Q, L)
        kernel = _make_grouped_kernel(F)
        inputs = (x2d, gamma_row, beta_row, m, mt)
        in_specs = [x_spec, row_spec, row_spec,
                    pl.BlockSpec((L, Q), lambda i: (0, 0)),
                    pl.BlockSpec((Q, L), lambda i: (0, 0))]

    return pl.pallas_call(
        kernel,
        out_shape=jax.ShapeDtypeStruct((P, L), x2d.dtype),
        grid_spec=pltpu.PrefetchScalarGridSpec(
            num_scalar_prefetch=0,
            grid=grid,
            in_specs=in_specs,
            out_specs=out_spec,
        ),
        compiler_params=pltpu.CompilerParams(
            dimension_semantics=("parallel",),
            # Explicit scoped-VMEM limit: works on v5e (16 MiB default) and
            # stays well inside v7x's 64 MiB physical VMEM.
            vmem_limit_bytes=32 * 1024 * 1024,
        ),
    )(*inputs)


# ---------------------------------------------------------------------------
# Public wrapper (matches nussl LayerNorm.forward)
# ---------------------------------------------------------------------------

def layer_norm(data, gamma, beta, feature_dims):
    """JAX/Pallas equivalent of nussl LayerNorm.forward.

    data: any-rank array (canonically (nb, nt, nf, nc)); its dtype is preserved.
    gamma/beta: (num_features,) affine parameters.
    feature_dims: dims holding the features (same meaning as the torch module).
    """
    data = jnp.asarray(data)
    gamma = jnp.asarray(gamma, jnp.float32).reshape(-1)
    beta = jnp.asarray(beta, jnp.float32).reshape(-1)
    feature_dims = list(feature_dims)
    shape = data.shape

    # Fast path: single feature dim, native layout (no HBM transpose).  View the
    # contiguous tensor as (P, F * Q):
    #   P = prod(dims before d), F = shape[d] (normalized dim), Q = prod(dims after d).
    if len(feature_dims) == 1 and 0 <= feature_dims[0] < data.ndim:
        d = feature_dims[0]
        F = int(shape[d])
        Q = _prod(shape[d + 1:])
        P = _prod(shape[:d])
        if int(gamma.shape[0]) != F:
            raise ValueError(
                f"gamma/beta have {gamma.shape[0]} features but data dim {d} "
                f"has size {F}")
        if Q <= 64:  # group-mask matmul stays negligible next to HBM traffic
            x2d = data.reshape(P, F * Q)
            # gamma varies with f (the normalized dim) and is constant over q.
            gamma_row = jnp.repeat(gamma, Q)
            beta_row = jnp.repeat(beta, Q)
            out = _layernorm_flat(x2d, gamma_row, beta_row, F=F, Q=Q)
            return out.reshape(shape)

    # Generic path (multiple feature dims, or very wide trailing dims): mirror
    # the torch unsqueeze/transpose dance (this one does materialize transposes
    # in HBM) and run the plain row-LayerNorm kernel on the (rows, F_total) view.
    x = data
    for d in feature_dims:
        x = jnp.expand_dims(x, -1)
        x = jnp.swapaxes(x, d, -1)
    k = len(feature_dims)
    moved_shape = x.shape
    f_total = _prod(moved_shape[-k:])
    rows = _prod(moved_shape[:-k])
    num_features = int(gamma.shape[0])
    if int(moved_shape[-1]) != num_features or f_total % num_features != 0:
        raise ValueError(
            f"gamma/beta have {num_features} features but the last moved "
            f"feature dim has size {moved_shape[-1]}")
    reps = f_total // num_features
    gamma_row = jnp.tile(gamma, reps)
    beta_row = jnp.tile(beta, reps)
    flat = x.reshape(rows, f_total)
    out = _layernorm_flat(flat, gamma_row, beta_row, F=f_total, Q=1)
    out = out.reshape(moved_shape)
    for d in feature_dims[::-1]:
        out = jnp.swapaxes(out, -1, d)
        out = jnp.squeeze(out, -1)
    return out


# ---------------------------------------------------------------------------
# Pure-JAX reference (torch semantics) + demo
# ---------------------------------------------------------------------------

def _reference(data, gamma, beta, feature_dims):
    """Pure-JAX reference mirroring the torch module (unbiased var, eps=1e-8)."""
    x = jnp.asarray(data, jnp.float32)
    mean_dims = []
    for d in feature_dims:
        x = jnp.expand_dims(x, -1)
        x = jnp.swapaxes(x, d, -1)
        mean_dims.append(x.ndim - 1)
    mean = jnp.mean(x, axis=tuple(mean_dims), keepdims=True)
    var = jnp.var(x, axis=tuple(mean_dims), keepdims=True, ddof=1)  # unbiased
    x = (x - mean) / (var + 1e-8) ** 0.5
    x = x * jnp.asarray(gamma, jnp.float32) + jnp.asarray(beta, jnp.float32)
    for d in feature_dims[::-1]:
        x = jnp.swapaxes(x, -1, d)
        x = jnp.squeeze(x, -1)
    return x


if __name__ == "__main__":
    # Audio-representation style input: (nb, nt, nf, nc).
    nb, nt, nf, nc = 2, 8, 32, 4
    key = jax.random.PRNGKey(0)
    x = jax.random.normal(key, (nb, nt, nf, nc), dtype=jnp.float32)

    # Case 1: canonical use -- normalize the frequency dim, default affine init
    # (gamma=ones, beta=zeros).  Uses the transpose-free, lane-dense kernel path.
    gamma = jnp.ones((nf,), jnp.float32)
    beta = jnp.zeros((nf,), jnp.float32)
    out = jax.block_until_ready(layer_norm(x, gamma, beta, [2]))
    ref = _reference(x, gamma, beta, [2])
    assert out.shape == x.shape and out.dtype == x.dtype
    assert jnp.allclose(out, ref, atol=2e-5, rtol=2e-5), "case 1 mismatch"

    # Case 2: non-trivial gamma/beta to exercise the affine broadcast.
    kg, kb = jax.random.split(jax.random.PRNGKey(1))
    gamma2 = jax.random.normal(kg, (nf,), jnp.float32)
    beta2 = jax.random.normal(kb, (nf,), jnp.float32)
    out2 = jax.block_until_ready(layer_norm(x, gamma2, beta2, [2]))
    ref2 = _reference(x, gamma2, beta2, [2])
    assert jnp.allclose(out2, ref2, atol=2e-5, rtol=2e-5), "case 2 mismatch"

    # Case 3: multiple feature dims -> generic (torch-style move) fallback path.
    gamma3 = jnp.ones((nc,), jnp.float32)
    beta3 = jnp.zeros((nc,), jnp.float32)
    out3 = jax.block_until_ready(layer_norm(x, gamma3, beta3, [2, 3]))
    ref3 = _reference(x, gamma3, beta3, [2, 3])
    assert jnp.allclose(out3, ref3, atol=2e-5, rtol=2e-5), "case 3 mismatch"

    # Case 4: bf16 input stays bf16 in HBM (f32 math only on VMEM tiles).
    xb = x.astype(jnp.bfloat16)
    outb = jax.block_until_ready(layer_norm(xb, gamma, beta, [2]))
    assert outb.dtype == jnp.bfloat16
    refb = _reference(xb, gamma, beta, [2])
    assert jnp.allclose(outb.astype(jnp.float32), refb,
                        atol=5e-2, rtol=5e-2), "case 4 mismatch"

    print("KERNEL_OK")
</pallas_src>

<mosaic_0001>
module attributes {stable_mosaic.version = 11 : i64} {
  func.func @kernel(%arg0: i32, %arg1: memref<8x128xf32, #tpu.memory_space<vmem>>, %arg2: memref<1x128xf32, #tpu.memory_space<vmem>>, %arg3: memref<1x128xf32, #tpu.memory_space<vmem>>, %arg4: memref<128x4xf32, #tpu.memory_space<vmem>>, %arg5: memref<4x128xf32, #tpu.memory_space<vmem>>, %arg6: memref<8x128xf32, #tpu.memory_space<vmem>>) attributes {dimension_semantics = [#tpu.dimension_semantics<parallel>], iteration_bounds = array<i64: 2>, scalar_prefetch = 0 : i64, scratch_operands = 0 : i64, tpu.core_type = #tpu.core_type<tc>, window_params = [{transform_indices = @transform_0, window_bounds = array<i64: 8, 128>}, {pipeline_mode = #tpu.pipeline_mode<synchronous>, transform_indices = @transform_1, window_bounds = array<i64: 1, 128>}, {pipeline_mode = #tpu.pipeline_mode<synchronous>, transform_indices = @transform_2, window_bounds = array<i64: 1, 128>}, {pipeline_mode = #tpu.pipeline_mode<synchronous>, transform_indices = @transform_3, window_bounds = array<i64: 128, 4>}, {pipeline_mode = #tpu.pipeline_mode<synchronous>, transform_indices = @transform_4, window_bounds = array<i64: 4, 128>}, {transform_indices = @transform_5, window_bounds = array<i64: 8, 128>}]} {
    %c0 = arith.constant 0 : index
    %c0_0 = arith.constant 0 : index
    %0 = vector.load %arg1[%c0, %c0_0] : memref<8x128xf32, #tpu.memory_space<vmem>>, vector<8x128xf32>
    %c0_1 = arith.constant 0 : index
    %c0_2 = arith.constant 0 : index
    %1 = vector.load %arg4[%c0_1, %c0_2] : memref<128x4xf32, #tpu.memory_space<vmem>>, vector<128x4xf32>
    %c0_3 = arith.constant 0 : index
    %c0_4 = arith.constant 0 : index
    %2 = vector.load %arg5[%c0_3, %c0_4] : memref<4x128xf32, #tpu.memory_space<vmem>>, vector<4x128xf32>
    %cst = arith.constant dense<0.000000e+00> : vector<8x4xf32>
    %3 = tpu.matmul %0, %1, %cst {dimension_numbers = #tpu.dot_dimension_numbers<[1], [0], [0], [1], [0, 0, 1, 1], [], []>, precision = #tpu.contract_precision<fp32>} : vector<8x128xf32>, vector<128x4xf32>, vector<8x4xf32> -> vector<8x4xf32>
    %cst_5 = arith.constant 3.125000e-02 : f32
    %4 = vector.broadcast %cst_5 : f32 to vector<8x4xf32>
    %5 = arith.mulf %3, %4 : vector<8x4xf32>
    %cst_6 = arith.constant dense<0.000000e+00> : vector<8x128xf32>
    %6 = tpu.matmul %5, %2, %cst_6 {dimension_numbers = #tpu.dot_dimension_numbers<[1], [0], [0], [1], [0, 0, 1, 1], [], []>, precision = #tpu.contract_precision<fp32>} : vector<8x4xf32>, vector<4x128xf32>, vector<8x128xf32> -> vector<8x128xf32>
    %7 = arith.subf %0, %6 : vector<8x128xf32>
    %8 = arith.mulf %7, %7 : vector<8x128xf32>
    %cst_7 = arith.constant dense<0.000000e+00> : vector<8x4xf32>
    %9 = tpu.matmul %8, %1, %cst_7 {dimension_numbers = #tpu.dot_dimension_numbers<[1], [0], [0], [1], [0, 0, 1, 1], [], []>, precision = #tpu.contract_precision<fp32>} : vector<8x128xf32>, vector<128x4xf32>, vector<8x4xf32> -> vector<8x4xf32>
    %cst_8 = arith.constant 3.100000e+01 : f32
    %10 = vector.broadcast %cst_8 : f32 to vector<8x4xf32>
    %11 = arith.divf %9, %10 : vector<8x4xf32>
    %cst_9 = arith.constant 9.99999993E-9 : f32
    %12 = vector.broadcast %cst_9 : f32 to vector<8x4xf32>
    %13 = arith.addf %11, %12 : vector<8x4xf32>
    %14 = math.rsqrt %13 : vector<8x4xf32>
    %cst_10 = arith.constant dense<0.000000e+00> : vector<8x128xf32>
    %15 = tpu.matmul %14, %2, %cst_10 {dimension_numbers = #tpu.dot_dimension_numbers<[1], [0], [0], [1], [0, 0, 1, 1], [], []>, precision = #tpu.contract_precision<fp32>} : vector<8x4xf32>, vector<4x128xf32>, vector<8x128xf32> -> vector<8x128xf32>
    %16 = arith.mulf %7, %15 : vector<8x128xf32>
    %c0_11 = arith.constant 0 : index
    %c0_12 = arith.constant 0 : index
    %17 = vector.load %arg2[%c0_11, %c0_12] : memref<1x128xf32, #tpu.memory_space<vmem>>, vector<1x128xf32>
    %18 = vector.broadcast %17 : vector<1x128xf32> to vector<8x128xf32>
    %19 = arith.mulf %16, %18 : vector<8x128xf32>
    %c0_13 = arith.constant 0 : index
    %c0_14 = arith.constant 0 : index
    %20 = vector.load %arg3[%c0_13, %c0_14] : memref<1x128xf32, #tpu.memory_space<vmem>>, vector<1x128xf32>
    %21 = vector.broadcast %20 : vector<1x128xf32> to vector<8x128xf32>
    %22 = arith.addf %19, %21 : vector<8x128xf32>
    %c0_15 = arith.constant 0 : index
    %c0_16 = arith.constant 0 : index
    %23 = vector.load %arg6[%c0_15, %c0_16] : memref<8x128xf32, #tpu.memory_space<vmem>>, vector<8x128xf32>
    tpu.vector_store %arg6[%c0_15, %c0_16], %22 {strides = array<i32>} : memref<8x128xf32, #tpu.memory_space<vmem>>, vector<8x128xf32>,
    return
  }
  func.func @transform_0(%arg0: i32) -> (i32, i32) {
    %c0_i32 = arith.constant 0 : i32
    %c0_i32_0 = arith.constant 0 : i32
    return %arg0, %c0_i32 : i32, i32
  }
  func.func @transform_1(%arg0: i32) -> (i32, i32) {
    %c0_i32 = arith.constant 0 : i32
    %c0_i32_0 = arith.constant 0 : i32
    %c0_i32_1 = arith.constant 0 : i32
    return %c0_i32, %c0_i32_0 : i32, i32
  }
  func.func @transform_2(%arg0: i32) -> (i32, i32) {
    %c0_i32 = arith.constant 0 : i32
    %c0_i32_0 = arith.constant 0 : i32
    %c0_i32_1 = arith.constant 0 : i32
    return %c0_i32, %c0_i32_0 : i32, i32
  }
  func.func @transform_3(%arg0: i32) -> (i32, i32) {
    %c0_i32 = arith.constant 0 : i32
    %c0_i32_0 = arith.constant 0 : i32
    %c0_i32_1 = arith.constant 0 : i32
    return %c0_i32, %c0_i32_0 : i32, i32
  }
  func.func @transform_4(%arg0: i32) -> (i32, i32) {
    %c0_i32 = arith.constant 0 : i32
    %c0_i32_0 = arith.constant 0 : i32
    %c0_i32_1 = arith.constant 0 : i32
    return %c0_i32, %c0_i32_0 : i32, i32
  }
  func.func @transform_5(%arg0: i32) -> (i32, i32) {
    %c0_i32 = arith.constant 0 : i32
    %c0_i32_0 = arith.constant 0 : i32
    return %arg0, %c0_i32 : i32, i32
  }
}

</mosaic_0001>

<bundles_post_ra>
// kernel: tpu_custom_call.1
= control target key start
LH: loop header
LB: loop body
LE: loop exit
PB: predicated region body
PF: predicated region fallthrough
CT: control target
= control target key end

     0   :  { %10 = vsyncpa [#allocation3], 0  ;;  %s2052_s0 = inlined_call_operand.vmem [shape: f32[16,128], index: 0, kind: input, shape index: {}]   ;;  %s2053_s1 = inlined_call_operand.vmem [shape: f32[1,128], index: 1, kind: input, shape index: {}]   ;;  %s2054_s2 = inlined_call_operand.vmem [shape: f32[1,128], index: 2, kind: input, shape index: {}]   ;;  %s2055_s3 = inlined_call_operand.vmem [shape: f32[128,4], index: 3, kind: input, shape index: {}]   ;;  %s2056_s4 = inlined_call_operand.vmem [shape: f32[4,128], index: 4, kind: input, shape index: {}]   ;;  %s2057_s5 = inlined_call_operand.hbm [shape: f32[16,128], index: 5, kind: output, shape index: {}]  }
   0x1   :  { %12 = vsyncpa [#allocation3 + $0x1], 0  ;;  %s1483_s18 = smov 0   ;;  %s1485_s19 = smov 0  }
   0x2   :  { %s1487_s20 = smov 0   ;;  %s1489_s21 = smov 0  }
   0x3 LB: > { %s1504_s22 = sadd.s32 4294967295, %s1450_s21   ;;  %s1332_s23 = sadd.s32 4294967294, %s1450_s21   ;;  %s1450_s21 = sphi %s1489_s21, %s2087_s21   ;;  %s1446_s20 = sphi %s1487_s20, %s2086_s20   ;;  %s1442_s19 = sphi %s1485_s19, %s2085_s19   ;;  %s1438_s18 = sphi %s1483_s18, %s2084_s18  }
   0x4   : > { %s1508_s24 = sadd.s32 1, %s1450_s21   ;;  %s135_s25 = sadd.s32 1, %s1446_s20 }
   0x5   : > { %s132_s26 = ssub.s32 %s1450_s21, %s1508_s24  ;;  %p145_p0 = scmp.ne.s32.totalorder %s1446_s20, %s1442_s19 }
   0x6   : > { %p133_p1 = scmp.eq.s32.totalorder %s132_s26, 0  ;;  %p146_p2 = scmp.eq.s32.totalorder %s1504_s22, 1 }
   0x7   : > { %p151_p3 = scmp.ne.s32.totalorder %s1442_s19, %s1438_s18  ;;  %p152_p4 = scmp.eq.s32.totalorder %s1332_s23, 1 }
   0x8   : > { %s1519_s27 = scalar_select %p133_p1, %s1446_s20, %s135_s25  }
   0x9   : > { %p1521_p5 = por %p146_p2, %p145_p0  ;;  %p1525_p6 = por %p152_p4, %p151_p3 }
   0xa   : > { %p1335_p7 = scmp.ge.s32.totalorder %s1450_s21, 1  ;;  %p189_p8 = scmp.lt.s32.totalorder %s1450_s21, 3 }
   0xc   : > { %p190_p9 = pnand %p1335_p7, %p189_p8 }
   0xe   : > { %193 = sbr.rel (%p190_p9) target bundleno = 732 (0x2dc), region = 40 }
  0x13   : > { %v236_v0 = vld [vmem:[%s2055_s3 + $0x78] sm:$0xff]  ;;  %v235_v1 = vld [vmem:[%s2055_s3 + $0x70] sm:$0xff]  ;;  %v234_v2 = vld [vmem:[%s2055_s3 + $0x68] sm:$0xff]  ;;  %p216_p10 = scmp.lt.s32.totalorder %s1504_s22, 1  ;;  %vm584_vm0 = vcmask 1043456   ;;  %vm580_vm1 = vcmask 31744  }
  0x14   : > { %v1540_v3 = vand.u32 4294901760, %v236_v0  ;;  %v1542_v4 = vand.u32 4294901760, %v235_v1  ;;  %v1544_v5 = vand.u32 4294901760, %v234_v2  ;;  %v233_v6 = vld [vmem:[%s2055_s3 + $0x60] sm:$0xff]  ;;  %v232_v7 = vld [vmem:[%s2055_s3 + $0x58] sm:$0xff]  ;;  %v231_v8 = vld [vmem:[%s2055_s3 + $0x50] sm:$0xff] }
  0x15   : > { %v1555_v9 = vand.u32 4294901760, %v233_v6  ;;  %v1557_v10 = vand.u32 4294901760, %v232_v7  ;;  %v1559_v11 = vand.u32 4294901760, %v231_v8  ;;  %v230_v12 = vld [vmem:[%s2055_s3 + $0x48] sm:$0xff]  ;;  %v229_v13 = vld [vmem:[%s2055_s3 + $0x40] sm:$0xff]  ;;  %v228_v18 = vld [vmem:[%s2055_s3 + $0x38] sm:$0xff] }
  0x16   : > { %239 = vmatpush.msra.mxu0 %v1540_v3  ;;  %v1569_v14 = vsub.f32 %v236_v0, %v1540_v3  ;;  %v1572_v15 = vsub.f32 %v235_v1, %v1542_v4  ;;  %v1575_v16 = vsub.f32 %v234_v2, %v1544_v5  ;;  %v1577_v17 = vand.u32 4294901760, %v230_v12  ;;  %435 = vmatpush.msra.mxu3 %v1540_v3  ;;  %v227_v26 = vld [vmem:[%s2055_s3 + $0x30] sm:$0xff]  ;;  %v226_v36 = vld [vmem:[%s2055_s3 + $0x28] sm:$0xff]  ;;  %s1641_s11 = scalar_select %p216_p10, %s1504_s22, 1  ;;  %v225_v42 = vld [vmem:[%s2055_s3 + $0x20] sm:$0xff] }
  0x17   : > { %v1584_v19 = vsub.f32 %v233_v6, %v1555_v9  ;;  %v1587_v20 = vsub.f32 %v232_v7, %v1557_v10  ;;  %v1590_v21 = vsub.f32 %v231_v8, %v1559_v11  ;;  %v1603_v25 = vand.u32 4294901760, %v229_v13  ;;  %v224_v47 = vld [vmem:[%s2055_s3 + $0x18] sm:$0xff]  ;;  %v223_v55 = vld [vmem:[%s2055_s3 + $0x10] sm:$0xff]  ;;  %v222_v60 = vld [vmem:[%s2055_s3 + $0x8] sm:$0xff]  ;;  %s213_s12 = sand.u32 1, %s1442_s19   ;;  %s1339_s14 = sshll.u32 %s1504_s22, 3 }
  0x18   : > { %241 = vmatpush.msra.mxu0 %v1542_v4  ;;  %v1595_v22 = vand.u32 4294901760, %v1569_v14  ;;  %v1598_v23 = vand.u32 4294901760, %v1572_v15  ;;  %v1601_v24 = vand.u32 4294901760, %v1575_v16  ;;  %382 = vmatpush.msra.mxu2 %v1569_v14  ;;  %v1612_v28 = vand.u32 4294901760, %v228_v18  ;;  %s1337_s16 = sshll.u32 %s1641_s11, 3  ;;  %v221_v1 = vld [vmem:[%s2055_s3] sm:$0xff]  ;;  %s1268_s25 = scalar_lea.hbm %s2057_s5, %s1339_s14 }
  0x19   : > { %v1610_v27 = vand.u32 4294901760, %v1584_v19  ;;  %v1615_v29 = vsub.f32 %v230_v12, %v1577_v17  ;;  %437 = vmatpush.msra.mxu3 %v1542_v4  ;;  %v1626_v33 = vand.u32 4294901760, %v1587_v20  ;;  %v1630_v34 = vand.u32 4294901760, %v1590_v21  ;;  %s219_s30 = scalar_lea.vmem %s2052_s0, %s1337_s16  ;;  %s1336_s13 = sshll.u32 %s213_s12, 3 }
  0x1a   : > { %243 = vmatpush.msra.mxu0 %v1544_v5  ;;  %v282_v30 = vsub.f32 %v1569_v14, %v1595_v22  ;;  %v288_v31 = vsub.f32 %v1572_v15, %v1598_v23  ;;  %v294_v32 = vsub.f32 %v1575_v16, %v1601_v24  ;;  %385 = vmatpush.msra.mxu2 %v1572_v15  ;;  %v1632_v35 = vand.u32 4294901760, %v227_v26  ;;  %v1743_v7 = vld [vmem:[%s219_s30] sm:$0xff]  ;;  %s215_s6 = scalar_lea.vmem [#allocation2], %s1336_s13  ;;  %s1272_s7 = sshll.u32 %s1268_s25, 4  ;;  %s1273_s7 = int_to_ptr.hbm [resolvable:$true] %s1272_s7 }
  0x1b   : > { %439 = vmatpush.msra.mxu3 %v1544_v5  ;;  %v300_v39 = vsub.f32 %v1584_v19, %v1610_v27  ;;  %v1651_v40 = vsub.f32 %v229_v13, %v1603_v25  ;;  %v1655_v41 = vand.u32 4294901760, %v1615_v29  ;;  %v306_v44 = vsub.f32 %v1587_v20, %v1626_v33  ;;  %2071 = vst [vmem:[#allocation8_spill] sm:$0xff] %v1743_v7  ;;  %s1270_s22 = sshll.u32 %s215_s6, 4  ;;  %s1258_s8 = scalar_lea.sflag [#allocation3], %s213_s12  ;;  %s1271_s22 = int_to_ptr.vmem [resolvable:$true] %s1270_s22 }
  0x1c   : > { %v1643_v37 = vand.u32 4294901760, %v282_v30  ;;  %245 = vmatpush.msra.mxu0 %v1555_v9  ;;  %v1646_v38 = vand.u32 4294901760, %v288_v31  ;;  %388 = vmatpush.msra.mxu2 %v1575_v16  ;;  %v1663_v43 = vand.u32 4294901760, %v294_v32  ;;  %v1667_v45 = vand.u32 4294901760, %v226_v36  ;;  %s1402_s9 = sshra.s32 %s1273_s7, 4  ;;  %s1408_s15 = scalar_lea.hbm %s2057_s5, 16  ;;  %s1403_s9 = int_to_ptr.hbm [resolvable:$true] %s1402_s9 }
  0x1d   : > { %441 = vmatpush.msra.mxu3 %v1555_v9  ;;  %v1670_v46 = vsub.f32 %v228_v18, %v1612_v28  ;;  %v312_v48 = vsub.f32 %v1590_v21, %v1630_v34  ;;  %v1682_v49 = vand.u32 4294901760, %v300_v39  ;;  %v1685_v50 = vand.u32 4294901760, %v1651_v40  ;;  %s1404_s10 = scalar_lea.hbm %s1403_s9, 8  ;;  %p1409_p0 = scmp.lt.s32.totalorder %s1403_s9, %s2057_s5 }
  0x1e   : > { %284 = vmatpush.msra.mxu1 %v1643_v37  ;;  %247 = vmatpush.msra.mxu0 %v1557_v10  ;;  %v1687_v51 = vand.u32 4294901760, %v225_v42  ;;  %v1690_v52 = vsub.f32 %v227_v26, %v1632_v35  ;;  %v318_v53 = vsub.f32 %v1615_v29, %v1655_v41  ;;  %v1694_v54 = vand.u32 4294901760, %v224_v47  ;;  %p1405_p11 = scmp.ne.s32.totalorder %s1403_s9, %s1404_s10  ;;  %p1410_p1 = scmp.lt.s32.totalorder %s1408_s15, %s1404_s10 }
  0x1f   : > { %391 = vmatpush.msra.mxu2 %v1584_v19  ;;  %443 = vmatpush.msra.mxu3 %v1557_v10  ;;  %v1703_v56 = vand.u32 4294901760, %v306_v44  ;;  %v1706_v57 = vand.u32 4294901760, %v1670_v46  ;;  %v1709_v58 = vsub.f32 %v226_v36, %v1667_v45  ;;  %v1714_v59 = vand.u32 4294901760, %v312_v48 }
  0x20   : > { %290 = vmatpush.msra.mxu1 %v1646_v38  ;;  %249 = vmatpush.msra.mxu0 %v1559_v11  ;;  %v324_v61 = vsub.f32 %v1651_v40, %v1685_v50  ;;  %v1726_v62 = vand.u32 4294901760, %v1690_v52  ;;  %v1728_v63 = vand.u32 4294901760, %v223_v55  ;;  %v1731_v0 = vsub.f32 %v225_v42, %v1687_v51  ;;  %p1406_p12 = pnand %p1405_p11, %p1521_p5  ;;  %p1411_p2 = por %p1410_p1, %p1409_p0 }
  0x21   : > { %394 = vmatpush.msra.mxu2 %v1587_v20  ;;  %445 = vmatpush.msra.mxu3 %v1559_v11  ;;  %2068 = vst [vmem:[#allocation5_spill] sm:$0xff] %v1703_v56  ;;  %v1736_v2 = vand.u32 4294901760, %v318_v53  ;;  %v1739_v6 = vsub.f32 %v224_v47, %v1694_v54  ;;  %v330_v8 = vsub.f32 %v1670_v46, %v1706_v57  ;;  %v1750_v12 = vand.u32 4294901760, %v1709_v58 }
  0x22   : > { %296 = vmatpush.msra.mxu1 %v1663_v43  ;;  %251 = vmatpush.msra.mxu0 %v1577_v17  ;;  %2069 = vst [vmem:[#allocation6_spill] sm:$0xff] %v1714_v59  ;;  %v1752_v13 = vand.u32 4294901760, %v222_v60  ;;  %v1755_v18 = vand.u32 4294901760, %v1743_v7  ;;  %v1757_v26 = vand.u32 4294901760, %v221_v1  ;;  %v1763_v30 = vand.u32 4294901760, %v324_v61  ;;  %p1407_p13 = pneg %p1406_p12 }
  0x23   : > { %397 = vmatpush.msra.mxu2 %v1590_v21  ;;  %447 = vmatpush.msra.mxu3 %v1577_v17  ;;  %2070 = vst [vmem:[#allocation7_spill] sm:$0xff] %v1736_v2  ;;  %v336_v31 = vsub.f32 %v1690_v52, %v1726_v62  ;;  %v1768_v32 = vand.u32 4294901760, %v1731_v0  ;;  %v1771_v36 = vsub.f32 %v223_v55, %v1728_v63  ;;  %v1774_v39 = vand.u32 4294901760, %v1739_v6 }
  0x24   : > { %302 = vmatpush.msra.mxu1 %v1682_v49  ;;  %253 = vmatpush.msra.mxu0 %v1603_v25  ;;  %2072 = vst [vmem:[#allocation9_spill] sm:$0xff] %v1763_v30  ;;  %v1780_v42 = vand.u32 4294901760, %v330_v8  ;;  %v342_v44 = vsub.f32 %v1709_v58, %v1750_v12  ;;  %v1785_v47 = vsub.f32 %v222_v60, %v1752_v13  ;;  %p1412_p3 = pnand %p1411_p2, %p1407_p13 }
  0x25   : > { %400 = vmatpush.msra.mxu2 %v1615_v29  ;;  %449 = vmatpush.msra.mxu3 %v1603_v25  ;;  %v271_v48 = vsub.f32 %v1743_v7, %v1755_v18  ;;  %v1793_v53 = vand.u32 4294901760, %v336_v31  ;;  %v348_v55 = vsub.f32 %v1731_v0, %v1768_v32  ;;  %v1798_v61 = vand.u32 4294901760, %v1771_v36 }
  0x26   : > { %308 = vmatpush.msra.mxu1 %v1703_v56  ;;  %255 = vmatpush.msra.mxu0 %v1612_v28  ;;  %2073 = vst [vmem:[#allocation10_spill] sm:$0xff] %v1780_v42  ;;  %v1801_v60 = vsub.f32 %v221_v1, %v1757_v26  ;;  %v1807_v8 = vand.u32 4294901760, %v342_v44  ;;  %v354_v31 = vsub.f32 %v1739_v6, %v1774_v39  ;;  %v1812_v7 = vand.u32 4294901760, %v1785_v47 }
  0x27   : > { %403 = vmatpush.msra.mxu2 %v1651_v40  ;;  %451 = vmatpush.msra.mxu3 %v1612_v28  ;;  %2074 = vst [vmem:[#allocation11_spill] sm:$0xff] %v1793_v53  ;;  %v1818_v1 = vand.u32 4294901760, %v348_v55  ;;  %v360_v44 = vsub.f32 %v1771_v36, %v1798_v61 }
  0x28   : > { %314 = vmatpush.msra.mxu1 %v1714_v59  ;;  %257 = vmatpush.msra.mxu0 %v1632_v35  ;;  %2075 = vst [vmem:[#allocation12_spill] sm:$0xff] %v1807_v8  ;;  %v366_v55 = vsub.f32 %v1785_v47, %v1812_v7 }
  0x29   : > { %406 = vmatpush.msra.mxu2 %v1670_v46  ;;  %453 = vmatpush.msra.mxu3 %v1632_v35  ;;  %v1837_v59 = vand.u32 4294901760, %v360_v44 }
  0x2a   : > { %320 = vmatpush.msra.mxu1 %v1736_v2  ;;  %259 = vmatpush.msra.mxu0 %v1667_v45  ;;  %v1829_v2 = vand.u32 4294901760, %v354_v31  ;;  %v1844_v31 = vand.u32 4294901760, %v366_v55 }
  0x2b   : > { %409 = vmatpush.msra.mxu2 %v1690_v52  ;;  %455 = vmatpush.msra.mxu3 %v1667_v45 }
  0x2c   : > { %326 = vmatpush.msra.mxu1 %v1763_v30  ;;  %261 = vmatpush.msra.mxu0 %v1687_v51  ;;  %v272_v30 = vand.u32 4294901760, %v271_v48 }
  0x2d   : > { %412 = vmatpush.msra.mxu2 %v1709_v58  ;;  %457 = vmatpush.msra.mxu3 %v1687_v51 }
  0x2e   : > { %332 = vmatpush.msra.mxu1 %v1780_v42  ;;  %263 = vmatpush.msra.mxu0 %v1694_v54  ;;  %v1823_v42 = vand.u32 4294901760, %v1801_v60 }
  0x2f   : > { %415 = vmatpush.msra.mxu2 %v1731_v0  ;;  %459 = vmatpush.msra.mxu3 %v1694_v54 }
  0x30   : > { %338 = vmatpush.msra.mxu1 %v1793_v53  ;;  %265 = vmatpush.msra.mxu0 %v1728_v63  ;;  %v273_v53 = vsub.f32 %v271_v48, %v272_v30 }
  0x31   : > { %418 = vmatpush.msra.mxu2 %v1739_v6  ;;  %461 = vmatpush.msra.mxu3 %v1728_v63 }
  0x32   : > { %344 = vmatpush.msra.mxu1 %v1807_v8  ;;  %267 = vmatpush.msra.mxu0 %v1752_v13  ;;  %v372_v8 = vsub.f32 %v1801_v60, %v1823_v42  ;;  %v274_v56 = vand.u32 4294901760, %v273_v53 }
  0x33   : > { %421 = vmatpush.msra.mxu2 %v1771_v36  ;;  %463 = vmatpush.msra.mxu3 %v1752_v13 }
  0x34   : > { %350 = vmatpush.msra.mxu1 %v1818_v1  ;;  %269 = vmatpush.msra.mxu0 %v1757_v26  ;;  %v1850_v44 = vand.u32 4294901760, %v372_v8 }
  0x35   : > { %424 = vmatpush.msra.mxu2 %v1785_v47  ;;  %465 = vmatpush.msra.mxu3 %v1757_v26 }
  0x36   : > { %476 = vmatpush.msrb.mxu0 %v1595_v22  ;;  %356 = vmatpush.msra.mxu1 %v1829_v2 }
  0x37   : > { %427 = vmatpush.msra.mxu2 %v1801_v60  ;;  %469 = vmatmul.f32.vlgmr.msra.gmra.mxu3 %v272_v30 }
  0x38   : > { %480 = vmatpush.msrb.mxu0 %v1598_v23  ;;  %362 = vmatpush.msra.mxu1 %v1837_v59 }
  0x39   : > { %430 = vmatmul.f32.vlgmr.msra.gmra.mxu2 %v271_v48  ;;  %275 = vmatmul.f32.vlgmr.msra.gmra.mxu0 %v274_v56 }
  0x3a   : > { %484 = vmatpush.msrb.mxu0 %v1601_v24  ;;  %368 = vmatpush.msra.mxu1 %v1844_v31 }
  0x3c   : > { %488 = vmatpush.msrb.mxu0 %v1610_v27  ;;  %374 = vmatpush.msra.mxu1 %v1850_v44 }
  0x3d   : > { %376 = vmatmul.f32.vlgmr.msra.gmra.mxu1 %v1755_v18 }
  0x3e   : > { %543 = vmatpush.msrb.mxu1 %v1540_v3  ;;  %492 = vmatpush.msrb.mxu0 %v1626_v33 }
  0x40   : > { %545 = vmatpush.msrb.mxu1 %v1542_v4  ;;  %496 = vmatpush.msrb.mxu0 %v1630_v34 }
  0x42   : > { %547 = vmatpush.msrb.mxu1 %v1544_v5  ;;  %500 = vmatpush.msrb.mxu0 %v1655_v41 }
  0x44   : > { %549 = vmatpush.msrb.mxu1 %v1555_v9  ;;  %504 = vmatpush.msrb.mxu0 %v1685_v50 }
  0x46   : > { %551 = vmatpush.msrb.mxu1 %v1557_v10  ;;  %508 = vmatpush.msrb.mxu0 %v1706_v57 }
  0x48   : > { %553 = vmatpush.msrb.mxu1 %v1559_v11  ;;  %512 = vmatpush.msrb.mxu0 %v1726_v62 }
  0x4a   : > { %555 = vmatpush.msrb.mxu1 %v1577_v17  ;;  %516 = vmatpush.msrb.mxu0 %v1750_v12 }
  0x4c   : > { %557 = vmatpush.msrb.mxu1 %v1603_v25  ;;  %520 = vmatpush.msrb.mxu0 %v1768_v32 }
  0x4e   : > { %559 = vmatpush.msrb.mxu1 %v1612_v28  ;;  %524 = vmatpush.msrb.mxu0 %v1774_v39 }
  0x50   : > { %561 = vmatpush.msrb.mxu1 %v1632_v35  ;;  %528 = vmatpush.msrb.mxu0 %v1798_v61 }
  0x52   : > { %563 = vmatpush.msrb.mxu1 %v1667_v45  ;;  %532 = vmatpush.msrb.mxu0 %v1812_v7 }
  0x54   : > { %565 = vmatpush.msrb.mxu1 %v1687_v51  ;;  %536 = vmatpush.msrb.mxu0 %v1823_v42 }
  0x55   : > { %538 = vmatmul.f32.vlgmr.msrb.gmra.mxu0 %v1755_v18 }
  0x56   : > { %567 = vmatpush.msrb.mxu1 %v1694_v54  ;;  %880 = vmatpush.msra.mxu0 %v1569_v14  ;;  %v237_v14 = vld [vmem:[%s2056_s4] sm:$0xf] }
  0x58   : > { %569 = vmatpush.msrb.mxu1 %v1728_v63  ;;  %883 = vmatpush.msra.mxu0 %v1572_v15  ;;  %v586_v15 = vsel %vm584_vm0, %v237_v14, 0 }
  0x5a   : > { %571 = vmatpush.msrb.mxu1 %v1752_v13  ;;  %886 = vmatpush.msra.mxu0 %v1575_v16  ;;  %v1922_v16 = vand.u32 4294901760, %v586_v15 }
  0x5c   : > { %573 = vmatpush.msrb.mxu1 %v1757_v26  ;;  %889 = vmatpush.msra.mxu0 %v1584_v19  ;;  %v1925_v19 = vsub.f32 %v586_v15, %v1922_v16 }
  0x5d   : > { %575 = vmatmul.f32.vlgmr.msrb.gmra.mxu1 %v1755_v18  ;;  %604 = vmatpush.msrb.mxu2 %v1922_v16 }
  0x5e   : > { %933 = vmatpush.msra.mxu1 %v1540_v3  ;;  %892 = vmatpush.msra.mxu0 %v1587_v20  ;;  %v1930_v20 = vand.u32 4294901760, %v1925_v19 }
  0x5f   : > { %657 = vmatpush.msra.mxu2 %v1925_v19 }
  0x60   : > { %935 = vmatpush.msra.mxu1 %v1542_v4  ;;  %895 = vmatpush.msra.mxu0 %v1590_v21  ;;  %v632_v21 = vsub.f32 %v1925_v19, %v1930_v20 }
  0x62   : > { %937 = vmatpush.msra.mxu1 %v1544_v5  ;;  %898 = vmatpush.msra.mxu0 %v1615_v29  ;;  %v633_v29 = vand.u32 4294901760, %v632_v21  ;;  %v2076_v21 = vld [vmem:[#allocation5_spill] sm:$0xff] }
  0x64   : > { %939 = vmatpush.msra.mxu1 %v1555_v9  ;;  %901 = vmatpush.msra.mxu0 %v1651_v40 }
  0x65   : > { %634 = vmatpush.msrb.mxu3 %v633_v29 }
  0x66   : > { %941 = vmatpush.msra.mxu1 %v1557_v10  ;;  %904 = vmatpush.msra.mxu0 %v1670_v46 }
  0x67   : > { %680 = vmatpush.msra.mxu3 %v1922_v16 }
  0x68   : > { %943 = vmatpush.msra.mxu1 %v1559_v11  ;;  %907 = vmatpush.msra.mxu0 %v1690_v52 }
  0x6a   : > { %945 = vmatpush.msra.mxu1 %v1577_v17  ;;  %910 = vmatpush.msra.mxu0 %v1709_v58 }
  0x6c   : > { %947 = vmatpush.msra.mxu1 %v1603_v25  ;;  %913 = vmatpush.msra.mxu0 %v1731_v0 }
  0x6e   : > { %949 = vmatpush.msra.mxu1 %v1612_v28  ;;  %916 = vmatpush.msra.mxu0 %v1739_v6 }
  0x70   : > { %951 = vmatpush.msra.mxu1 %v1632_v35  ;;  %919 = vmatpush.msra.mxu0 %v1771_v36 }
  0x72   : > { %953 = vmatpush.msra.mxu1 %v1667_v45  ;;  %922 = vmatpush.msra.mxu0 %v1785_v47 }
  0x74   : > { %955 = vmatpush.msra.mxu1 %v1687_v51  ;;  %925 = vmatpush.msra.mxu0 %v1801_v60 }
  0x76   : > { %957 = vmatpush.msra.mxu1 %v1694_v54  ;;  %1115 = vmatpush.msrb.mxu0 %v1922_v16 }
  0x78   : > { %959 = vmatpush.msra.mxu1 %v1728_v63 }
  0x7a   : > { %961 = vmatpush.msra.mxu1 %v1752_v13 }
  0x7c   : > { %963 = vmatpush.msra.mxu1 %v1757_v26 }
  0x7e   : > { %1145 = vmatpush.msrb.mxu1 %v633_v29  ;;  %v2077_v29 = vld [vmem:[#allocation6_spill] sm:$0xff] }
  0xb6   : > { %v276_v46 = vpop.f32.mrf.mxu0 }
  0xba   : > { %v377_v40 = vpop.f32.mrf.mxu1  ;;  %v470_v0 = vpop.f32.mrf.mxu3 }
  0xbb   : > { %v378_v52 = vadd.f32 %v377_v40, %v276_v46  ;;  %v2078_v40 = vld [vmem:[#allocation7_spill] sm:$0xff] }
  0xbc   : > { %v431_v56 = vpop.f32.mrf.mxu2 }
  0xbd   : > { %v432_v58 = vadd.f32 %v431_v56, %v378_v52 }
  0xbf   : > { %v471_v6 = vadd.f32 %v470_v0, %v432_v58 }
  0xd2   : > { %v539_v18 = vpop.f32.mrf.mxu0 }
  0xd3   : > { %v540_v30 = vadd.f32 %v539_v18, %v471_v6 }
  0xda   : > { %v576_v36 = vpop.f32.mrf.mxu1 }
  0xdb   : > { %v577_v47 = vadd.f32 %v576_v36, %v540_v30 }
  0xdd   : > { %v579_v48 = vmul.f32 0.03125, %v577_v47 }
  0xdf   : > { %v582_v53 = vsel %vm580_vm1, %v579_v48, 0 }
  0xe0   : > { %v605_v60 = vand.u32 4294901760, %v582_v53 }
  0xe2   : > { %v606_v8 = vsub.f32 %v582_v53, %v605_v60  ;;  %636 = vmatmul.f32.vlgmr.msrb.gmra.mxu3 %v605_v60 }
  0xe3   : > { %728 = vmatpush.msrb.mxu3 %v1922_v16 }
  0xe4   : > { %v607_v55 = vand.u32 4294901760, %v606_v8 }
  0xe6   : > { %v608_v14 = vsub.f32 %v606_v8, %v607_v55 }
  0xe8   : > { %v609_v15 = vand.u32 4294901760, %v608_v14 }
  0xea   : > { %610 = vmatmul.f32.vlgmr.msrb.gmra.mxu2 %v609_v15  ;;  %684 = vmatmul.f32.vlgmr.msra.gmra.mxu3 %v607_v55 }
  0xeb   : > { %706 = vmatpush.msrb.mxu2 %v1930_v20  ;;  %782 = vmatpush.msra.mxu3 %v1643_v37  ;;  %v2079_v37 = vld [vmem:[#allocation9_spill] sm:$0xff] }
  0xed   : > { %788 = vmatpush.msra.mxu3 %v1646_v38  ;;  %v2080_v38 = vld [vmem:[#allocation10_spill] sm:$0xff] }
  0xef   : > { %794 = vmatpush.msra.mxu3 %v1663_v43  ;;  %v2081_v43 = vld [vmem:[#allocation11_spill] sm:$0xff] }
  0xf1   : > { %800 = vmatpush.msra.mxu3 %v1682_v49  ;;  %v2082_v49 = vld [vmem:[#allocation12_spill] sm:$0xff] }
  0xf2   : > { %660 = vmatmul.f32.vlgmr.msra.gmra.mxu2 %v606_v8  ;;  %730 = vmatmul.f32.vlgmr.msrb.gmra.mxu3 %v605_v60 }
  0xf3   : > { %737 = vmatpush.msra.mxu2 %v1540_v3  ;;  %806 = vmatpush.msra.mxu3 %v2076_v21 }
  0xf5   : > { %739 = vmatpush.msra.mxu2 %v1542_v4  ;;  %812 = vmatpush.msra.mxu3 %v2077_v29 }
  0xf7   : > { %741 = vmatpush.msra.mxu2 %v1544_v5  ;;  %818 = vmatpush.msra.mxu3 %v2078_v40 }
  0xf9   : > { %743 = vmatpush.msra.mxu2 %v1555_v9  ;;  %824 = vmatpush.msra.mxu3 %v2079_v37 }
  0xfa   : > { %708 = vmatmul.f32.vlgmr.msrb.gmra.mxu2 %v605_v60 }
  0xfb   : > { %745 = vmatpush.msra.mxu2 %v1557_v10  ;;  %830 = vmatpush.msra.mxu3 %v2080_v38 }
  0xfd   : > { %747 = vmatpush.msra.mxu2 %v1559_v11  ;;  %836 = vmatpush.msra.mxu3 %v2081_v43 }
  0xff   : > { %749 = vmatpush.msra.mxu2 %v1577_v17  ;;  %842 = vmatpush.msra.mxu3 %v2082_v49 }
 0x101   : > { %751 = vmatpush.msra.mxu2 %v1603_v25  ;;  %848 = vmatpush.msra.mxu3 %v1818_v1 }
 0x103   : > { %753 = vmatpush.msra.mxu2 %v1612_v28  ;;  %854 = vmatpush.msra.mxu3 %v1829_v2 }
 0x105   : > { %755 = vmatpush.msra.mxu2 %v1632_v35  ;;  %860 = vmatpush.msra.mxu3 %v1837_v59 }
 0x107   : > { %757 = vmatpush.msra.mxu2 %v1667_v45  ;;  %866 = vmatpush.msra.mxu3 %v1844_v31 }
 0x109   : > { %759 = vmatpush.msra.mxu2 %v1687_v51  ;;  %872 = vmatpush.msra.mxu3 %v1850_v44 }
 0x10b   : > { %1041 = vmatpush.msrb.mxu3 %v1540_v3  ;;  %761 = vmatpush.msra.mxu2 %v1694_v54 }
 0x10d   : > { %1043 = vmatpush.msrb.mxu3 %v1542_v4  ;;  %763 = vmatpush.msra.mxu2 %v1728_v63 }
 0x10f   : > { %1045 = vmatpush.msrb.mxu3 %v1544_v5  ;;  %765 = vmatpush.msra.mxu2 %v1752_v13 }
 0x111   : > { %1047 = vmatpush.msrb.mxu3 %v1555_v9  ;;  %767 = vmatpush.msra.mxu2 %v1757_v26 }
 0x113   : > { %974 = vmatpush.msrb.mxu2 %v1595_v22  ;;  %1049 = vmatpush.msrb.mxu3 %v1557_v10 }
 0x115   : > { %978 = vmatpush.msrb.mxu2 %v1598_v23  ;;  %1051 = vmatpush.msrb.mxu3 %v1559_v11 }
 0x117   : > { %982 = vmatpush.msrb.mxu2 %v1601_v24  ;;  %1053 = vmatpush.msrb.mxu3 %v1577_v17 }
 0x119   : > { %986 = vmatpush.msrb.mxu2 %v1610_v27  ;;  %1055 = vmatpush.msrb.mxu3 %v1603_v25  ;;  %v2083_v27 = vld [vmem:[#allocation8_spill] sm:$0xff] }
 0x11b   : > { %990 = vmatpush.msrb.mxu2 %v1626_v33  ;;  %1057 = vmatpush.msrb.mxu3 %v1612_v28 }
 0x11d   : > { %994 = vmatpush.msrb.mxu2 %v1630_v34  ;;  %1059 = vmatpush.msrb.mxu3 %v1632_v35 }
 0x11f   : > { %998 = vmatpush.msrb.mxu2 %v1655_v41  ;;  %1061 = vmatpush.msrb.mxu3 %v1667_v45 }
 0x121   : > { %1002 = vmatpush.msrb.mxu2 %v1685_v50  ;;  %1063 = vmatpush.msrb.mxu3 %v1687_v51  ;;  %v1452_v51 = vmov 31.0  }
 0x122   : > { %1384 = vrcp.f32 %v1452_v51 }
 0x123   : > { %1006 = vmatpush.msrb.mxu2 %v1706_v57  ;;  %1065 = vmatpush.msrb.mxu3 %v1694_v54 }
 0x125   : > { %1010 = vmatpush.msrb.mxu2 %v1726_v62  ;;  %1067 = vmatpush.msrb.mxu3 %v1728_v63 }
 0x127   : > { %1014 = vmatpush.msrb.mxu2 %v1750_v12  ;;  %1069 = vmatpush.msrb.mxu3 %v1752_v13 }
 0x128   : > { %v1385_v54 = vpop.eup %1384 }
 0x129   : > { %1018 = vmatpush.msrb.mxu2 %v1768_v32  ;;  %1071 = vmatpush.msrb.mxu3 %v1757_v26  ;;  %v1078_v57 = vmul.f32 31.0, %v1385_v54  ;;  %vm1082_vm2 = vweird.f32 %v1385_v54 }
 0x12b   : > { %1022 = vmatpush.msrb.mxu2 %v1774_v39  ;;  %v1079_v59 = vsub.f32 1.0, %v1078_v57 }
 0x12d   : > { %1026 = vmatpush.msrb.mxu2 %v1798_v61  ;;  %v1080_v12 = vmul.f32 %v1385_v54, %v1079_v59 }
 0x12f   : > { %1030 = vmatpush.msrb.mxu2 %v1812_v7  ;;  %v1081_v32 = vadd.f32 %v1385_v54, %v1080_v12 }
 0x131   : > { %1034 = vmatpush.msrb.mxu2 %v1823_v42  ;;  %v1083_v31 = vsel %vm1082_vm2, %v1385_v54, %v1081_v32 }
 0x165   : > { %v637_v3 = vpop.f32.mrf.mxu3 }
 0x16d   : > { %v611_v4 = vpop.f32.mrf.mxu2  ;;  %v685_v5 = vpop.f32.mrf.mxu3 }
 0x16e   : > { %v638_v10 = vadd.f32 %v637_v3, %v611_v4  ;;  %v1383_v4 = vld [vmem:[%s2054_s2] ss:$0 sm:$0xff] }
 0x175   : > { %v661_v9 = vpop.f32.mrf.mxu2  ;;  %v731_v24 = vpop.f32.mrf.mxu3 }
 0x176   : > { %v662_v11 = vadd.f32 %v661_v9, %v638_v10 }
 0x178   : > { %v686_v17 = vadd.f32 %v685_v5, %v662_v11 }
 0x17d   : > { %v709_v22 = vpop.f32.mrf.mxu2 }
 0x17e   : > { %v710_v23 = vadd.f32 %v709_v22, %v686_v17 }
 0x180   : > { %v732_v25 = vadd.f32 %v731_v24, %v710_v23 }
 0x182   : > { %v2004_v28 = vsub.f32 %v2083_v27, %v732_v25 }
 0x184   : > { %v735_v33 = vmul.f32 %v2004_v28, %v2004_v28 }
 0x186   : > { %v768_v34 = vand.u32 4294901760, %v735_v33 }
 0x188   : > { %874 = vmatmul.f32.vlgmr.msra.gmra.mxu3 %v768_v34  ;;  %v769_v35 = vsub.f32 %v735_v33, %v768_v34 }
 0x18a   : > { %928 = vmatmul.f32.vlgmr.msra.gmra.mxu0 %v769_v35  ;;  %v770_v41 = vand.u32 4294901760, %v769_v35 }
 0x18b   : > { %1168 = vmatpush.msra.mxu0 %v1925_v19 }
 0x18c   : > { %967 = vmatmul.f32.vlgmr.msra.gmra.mxu1 %v770_v41  ;;  %v771_v45 = vsub.f32 %v769_v35, %v770_v41 }
 0x18d   : > { %1191 = vmatpush.msra.mxu1 %v1922_v16 }
 0x18e   : > { %v772_v50 = vand.u32 4294901760, %v771_v45 }
 0x190   : > { %773 = vmatmul.f32.vlgmr.msra.gmra.mxu2 %v772_v50  ;;  %1073 = vmatmul.f32.vlgmr.msrb.gmra.mxu3 %v768_v34 }
 0x198   : > { %1036 = vmatmul.f32.vlgmr.msrb.gmra.mxu2 %v768_v34 }
 0x207   : > { %v929_v7 = vpop.f32.mrf.mxu0 }
 0x209   : > { %v968_v26 = vpop.f32.mrf.mxu1 }
 0x20b   : > { %v875_v62 = vpop.f32.mrf.mxu3 }
 0x213   : > { %v774_v63 = vpop.f32.mrf.mxu2  ;;  %v1074_v1 = vpop.f32.mrf.mxu3 }
 0x214   : > { %v876_v2 = vadd.f32 %v875_v62, %v774_v63 }
 0x216   : > { %v930_v13 = vadd.f32 %v929_v7, %v876_v2 }
 0x218   : > { %v969_v39 = vadd.f32 %v968_v26, %v930_v13 }
 0x21b   : > { %v1037_v42 = vpop.f32.mrf.mxu2 }
 0x21c   : > { %v1038_v61 = vadd.f32 %v1037_v42, %v969_v39 }
 0x21e   : > { %v1075_v44 = vadd.f32 %v1074_v1, %v1038_v61 }
 0x220   : > { %v1084_v19 = vmul.f32 %v1083_v31, %v1075_v44 }
 0x222   : > { %v1085_v46 = vadd.f32 1e-08, %v1084_v19 }
 0x224   : > { %1386 = vrsqrt.f32 %v1085_v46  ;;  %vm1092_vm4 = vweird.f32 %v1085_v46 }
 0x22a   : > { %v1387_v52 = vpop.eup %1386 }
 0x22b   : > { %v1087_v56 = vmul.f32 %v1387_v52, %v1085_v46  ;;  %vm1093_vm3 = vweird.f32 %v1387_v52 }
 0x22c   : > { %vm1094_vm5 = vmor %vm1092_vm4, %vm1093_vm3 }
 0x22d   : > { %v1088_v58 = vmul.f32 %v1387_v52, %v1087_v56 }
 0x22f   : > { %v1089_v0 = vmul.f32 0.5, %v1088_v58 }
 0x231   : > { %v1090_v6 = vsub.f32 1.5, %v1089_v0 }
 0x233   : > { %v1091_v18 = vmul.f32 %v1387_v52, %v1090_v6 }
 0x235   : > { %v1095_v30 = vsel %vm1094_vm5, %v1387_v52, %v1091_v18 }
 0x236   : > { %v1097_v36 = vsel %vm580_vm1, %v1095_v30, 0 }
 0x237   : > { %v1116_v47 = vand.u32 4294901760, %v1097_v36 }
 0x239   : > { %v1117_v48 = vsub.f32 %v1097_v36, %v1116_v47  ;;  %1147 = vmatmul.f32.vlgmr.msrb.gmra.mxu1 %v1116_v47 }
 0x23a   : > { %1239 = vmatpush.msrb.mxu1 %v1922_v16 }
 0x23b   : > { %v1118_v53 = vand.u32 4294901760, %v1117_v48 }
 0x23d   : > { %v1119_v60 = vsub.f32 %v1117_v48, %v1118_v53 }
 0x23f   : > { %v1120_v8 = vand.u32 4294901760, %v1119_v60 }
 0x241   : > { %1121 = vmatmul.f32.vlgmr.msrb.gmra.mxu0 %v1120_v8  ;;  %1195 = vmatmul.f32.vlgmr.msra.gmra.mxu1 %v1118_v53 }
 0x242   : > { %1217 = vmatpush.msrb.mxu0 %v1930_v20  ;;  %v1382_v20 = vld [vmem:[%s2053_s1] ss:$0 sm:$0xff] }
 0x249   : > { %1171 = vmatmul.f32.vlgmr.msra.gmra.mxu0 %v1117_v48  ;;  %1241 = vmatmul.f32.vlgmr.msrb.gmra.mxu1 %v1116_v47 }
 0x251   : > { %1219 = vmatmul.f32.vlgmr.msrb.gmra.mxu0 %v1116_v47 }
 0x2b6   : > { %v1148_v55 = vpop.f32.mrf.mxu1 }
 0x2be   : > { %v1122_v14 = vpop.f32.mrf.mxu0  ;;  %v1196_v15 = vpop.f32.mrf.mxu1 }
 0x2bf   : > { %v1149_v29 = vadd.f32 %v1148_v55, %v1122_v14 }
 0x2c6   : > { %v1172_v21 = vpop.f32.mrf.mxu0  ;;  %v1242_v43 = vpop.f32.mrf.mxu1 }
 0x2c7   : > { %v1173_v40 = vadd.f32 %v1172_v21, %v1149_v29 }
 0x2c9   : > { %v1197_v16 = vadd.f32 %v1196_v15, %v1173_v40 }
 0x2ce   : > { %v1220_v37 = vpop.f32.mrf.mxu0 }
 0x2cf   : > { %v1221_v38 = vadd.f32 %v1220_v37, %v1197_v16 }
 0x2d1   : > { %v1243_v49 = vadd.f32 %v1242_v43, %v1221_v38 }
 0x2d3   : > { %v1245_v3 = vmul.f32 %v1243_v49, %v2004_v28 }
 0x2d5   : > { %v1250_v5 = vmul.f32 %v1382_v20, %v1245_v3 }
 0x2d7   : > { %v1255_v9 = vadd.f32 %v1383_v4, %v1250_v5 }
 0x2d9   : > { %1256 = vst [vmem:[%s215_s6] sm:$0xff] %v1255_v9 }
 0x2da   : > { %1415 = shalt.err (!%p1412_p3)
}
 0x2db   : > { %1342 = dma.vmem_to_hbm [thread:$0]  (%p1521_p5), %s1271_s22, 128, %s1273_s7, %s1258_s8  }
 0x2dc PF: > { %p1348_p4 = scmp.ge.s32.totalorder %s1450_s21, 2  ;;  %s1284_s12 = sand.u32 1, %s1438_s18  }
 0x2dd   : > { %s1285_s17 = scalar_lea.sflag [#allocation3], %s1284_s12 }
 0x2de   : > { %p1345_p7 = pnand %p1348_p4, %p1525_p6 }
 0x2e0   : > { %p1346_p8 = pneg %p1345_p7 }
 0x2e2   : > { %1433 = dma.done.wait (%p1346_p8), %s1285_s17, 128  }
 0x2e3   : > { %1435 = vsyncadd (%p1346_p8), %s1285_s17, 4294967168  ;;  %p15_p9 = scmp.ge.s32.totalorder %s1508_s24, 4   ;;  %s2084_s18 = smov %s1442_s19 }
 0x2e4   : > { %s2085_s19 = smov %s1446_s20  ;;  %s2086_s20 = smov %s1519_s27 }
 0x2e5   : > { %s2087_s21 = smov %s1508_s24  ;;  %17 = sbr.rel (!%p15_p9) target bundleno = 3 (0x3), region = 75 }
 0x2ea   :  { %1291 = vsyncpa [#allocation3], 1 }
 0x2eb   :  { %1293 = vsyncpa [#allocation3 + $0x1], 1 }

</bundles_post_ra>
